<compile_context>
chip_gen: v6e
topology: v6e:2x2x1
jax: 0.10.0
libtpu: 0.0.40
codegen_flags: <defaults>
</compile_context>

<pallas_src>
import functools

import jax
import jax.numpy as jnp
from jax.experimental import pallas as pl
from jax.experimental.pallas import tpu as pltpu


# ----------------------------------------------------------------------------
# Kernels
# ----------------------------------------------------------------------------


def _rowwise_kernel(x_ref, l_ref, o_ref):
    """General fallback: one batch row per sublane, classes on lanes."""
    x = x_ref[...].astype(jnp.float32)
    lbl = l_ref[...].astype(jnp.float32)
    m = jnp.max(x, axis=-1, keepdims=True)
    e = jnp.exp(x - m)
    denom = jnp.sum(e, axis=-1, keepdims=True)
    numer = jnp.sum(e * lbl, axis=-1, keepdims=True)
    o_ref[...] = numer / denom  # exact divide (review correctness note)


def _packed_kernel(x_ref, l_ref, pick_ref, o_ref, *, C):
    """Lane-dense path: G = 128 // C batch rows packed per 128-lane row.

    Each batch row occupies one aligned C-lane segment of a 128-lane row, so
    DMA rows and vregs are fully populated.  Segment reductions use XLU rolls;
    the output compaction uses a 0/1 selection matmul on the idle MXU.
    """
    G = 128 // C
    x = x_ref[...].astype(jnp.float32)  # (T, 128)
    lbl = l_ref[...].astype(jnp.float32)
    lanes = jax.lax.broadcasted_iota(jnp.int32, (1, 128), 1)

    # Exact per-segment max, broadcast to every lane of its segment
    # (XOR butterfly over the log2(C) low lane-address bits).
    m = x
    s = 1
    while s < C:
        up = pltpu.roll(m, 128 - s, axis=1)  # up[i]   = m[i + s]
        down = pltpu.roll(m, s, axis=1)      # down[i] = m[i - s]
        m = jnp.maximum(m, jnp.where((lanes & s) == 0, up, down))
        s *= 2

    p = jnp.exp(x - m)  # <= 1 everywhere, no overflow
    q = p * lbl

    # Per-segment sums via a fold tree; after log2(C) steps only the
    # segment-start lanes (i % C == 0) hold the true segment sum -- which is
    # all we need for the per-batch-row output.
    s = 1
    while s < C:
        p = p + pltpu.roll(p, 128 - s, axis=1)
        q = q + pltpu.roll(q, 128 - s, axis=1)
        s *= 2

    # Exact divide.  Zero the don't-care lanes so an underflowed window sum at
    # a non-start lane (possible for extreme logits) cannot inject inf/NaN
    # into the compaction matmul below.  Start lanes always have denom >= 1.
    start = (lanes & (C - 1)) == 0
    ratio = jnp.where(start, q / p, 0.0)

    # Compact the G segment-start lanes to dense lanes 0..G-1 with a 0/1
    # selection matmul.  The hi/lo split keeps the picked values exact to
    # ~2^-18 even if the f32 matmul rounds its operands to bf16.
    pick = pick_ref[...]
    hi = ratio.astype(jnp.bfloat16).astype(jnp.float32)
    lo = ratio - hi
    dense = (jnp.dot(hi, pick, preferred_element_type=jnp.float32)
             + jnp.dot(lo, pick, preferred_element_type=jnp.float32))
    o_ref[...] = dense[:, :G]


# ----------------------------------------------------------------------------
# Tile sizing helpers
# ----------------------------------------------------------------------------


def _round_up(n: int, m: int) -> int:
    return ((n + m - 1) // m) * m


def _sublane_align(*dtypes) -> int:
    a = 8
    for dt in dtypes:
        isz = jnp.dtype(dt).itemsize
        if isz < 4:
            a = max(a, 8 * (4 // isz))  # packed sub-32-bit sublanes
    return a


def _vmem_budget_and_limit():
    """Generation-aware VMEM budget for the double-buffered tiles."""
    phys = 64 << 20  # conservative default (v7x has 64 MiB / TensorCore)
    try:
        phys = int(pltpu.get_tpu_info().vmem_capacity_bytes)
    except Exception:
        pass
    if phys < (16 << 20):
        phys = 64 << 20
    # v5e/v6e (128 MiB physical): ~47 MiB tile budget, 64 MiB scoped limit.
    # v7x    (64 MiB physical) : ~23 MiB tile budget, ~47 MiB scoped limit.
    budget = min((phys * 3) // 8, 48 << 20) - (1 << 20)
    limit = min((phys * 3) // 4, budget + (24 << 20), 64 << 20)
    return budget, limit


def _choose_tile_rows(n_rows, hbm_bytes_per_row, vmem_bytes_per_row, align, budget):
    """Largest row tile that fits the VMEM budget (no artificial row cap).

    Keeps >= 4 grid steps (software pipelining; grid sharding across v7x's two
    TensorCores) whenever a quarter of the batch still moves >= 2 MiB of real
    HBM traffic per step, so the ~0.35 us/step overhead stays hidden.
    """
    if n_rows <= align:
        return n_rows  # block equals the full array dim -> always legal
    rows = max(budget // max(vmem_bytes_per_row, 1), align)
    quarter = n_rows // 4
    if quarter * hbm_bytes_per_row >= (2 << 20):
        rows = min(rows, quarter)
    rows = max(align, (rows // align) * align)
    rows = min(rows, (n_rows // align) * align)  # blocks never exceed the array
    return rows


# ----------------------------------------------------------------------------
# Forward wrappers
# ----------------------------------------------------------------------------


def _forward_packed(x, label, budget, limit):
    B, C = x.shape
    G = 128 // C
    Bp = (B * C) // 128
    xp = x.reshape(Bp, 128)       # free row-major reshape (bitcast under jit)
    lp = label.reshape(Bp, 128)
    # pick[c, j] = 1 iff c == j*C: compacts segment-start lanes to lanes 0..G-1.
    idx = jnp.arange(128, dtype=jnp.int32)
    pick = (idx[:, None] == (C * idx)[None, :]).astype(jnp.float32)

    isx = jnp.dtype(x.dtype).itemsize
    isl = jnp.dtype(label.dtype).itemsize
    align = _sublane_align(x.dtype, label.dtype)
    # 2 pipeline buffers per input + generous allowance (16 block-sized f32
    # values) for in-kernel temporaries + double-buffered output.
    vmem_row = 2 * 128 * (isx + isl) + 16 * 4 * 128 + 2 * 4 * G
    hbm_row = 128 * (isx + isl) + 4 * G
    rows = _choose_tile_rows(Bp, hbm_row, vmem_row, align, budget)
    grid = (pl.cdiv(Bp, rows),)

    out = pl.pallas_call(
        functools.partial(_packed_kernel, C=C),
        out_shape=jax.ShapeDtypeStruct((Bp, G), jnp.float32),
        grid_spec=pl.GridSpec(
            grid=grid,
            in_specs=[
                pl.BlockSpec((rows, 128), lambda i: (i, 0)),
                pl.BlockSpec((rows, 128), lambda i: (i, 0)),
                pl.BlockSpec((128, 128), lambda i: (0, 0)),  # constant block
            ],
            out_specs=pl.BlockSpec((rows, G), lambda i: (i, 0)),
        ),
        compiler_params=pltpu.CompilerParams(
            dimension_semantics=("parallel",),
            vmem_limit_bytes=limit,
        ),
    )(xp, lp, pick)
    # out[r, g] is the result for batch row r*G + g -> row-major flatten = [B].
    return out.reshape(B)


def _forward_rowwise(x, label, budget, limit):
    B, C = x.shape
    isx = jnp.dtype(x.dtype).itemsize
    isl = jnp.dtype(label.dtype).itemsize
    align = _sublane_align(x.dtype, label.dtype)
    c_pad = _round_up(C, 128)  # C < 128 still occupies 128 lanes in VMEM
    vmem_row = 2 * (isx + isl) * c_pad + 8 * 4 * c_pad + 2 * 4
    hbm_row = (isx + isl) * C + 4
    rows = _choose_tile_rows(B, hbm_row, vmem_row, align, budget)
    grid = (pl.cdiv(B, rows),)

    out = pl.pallas_call(
        _rowwise_kernel,
        out_shape=jax.ShapeDtypeStruct((B, 1), jnp.float32),
        grid_spec=pl.GridSpec(
            grid=grid,
            in_specs=[
                pl.BlockSpec((rows, C), lambda i: (i, 0)),
                pl.BlockSpec((rows, C), lambda i: (i, 0)),
            ],
            # NOTE: (rows, 1) output lowers to masked stores; output volume is
            # only 1/(2C) of the input traffic so this fallback keeps it simple.
            out_specs=pl.BlockSpec((rows, 1), lambda i: (i, 0)),
        ),
        compiler_params=pltpu.CompilerParams(
            dimension_semantics=("parallel",),
            vmem_limit_bytes=limit,
        ),
    )(x, label)
    return out.reshape(B)


@jax.jit
def rel_is_al(x: jax.Array, label: jax.Array) -> jax.Array:
    """Pallas implementation of RelIsAL.forward (use_logit=False path).

    Args:
      x:     [B, C] logits.
      label: [B, C] one-hot or soft labels.
    Returns:
      [B] float32: sum(softmax(x, axis=1) * label, axis=1)
    """
    assert x.ndim == 2 and x.shape == label.shape, (x.shape, label.shape)
    B, C = x.shape
    budget, limit = _vmem_budget_and_limit()
    if 2 <= C < 128 and 128 % C == 0 and B % (128 // C) == 0:
        return _forward_packed(x, label, budget, limit)
    return _forward_rowwise(x, label, budget, limit)


# ----------------------------------------------------------------------------
# Self-test
# ----------------------------------------------------------------------------


def _reference(x, label):
    probs = jax.nn.softmax(x.astype(jnp.float32), axis=1)
    return jnp.sum(probs * label.astype(jnp.float32), axis=1)


if __name__ == "__main__":
    key = jax.random.PRNGKey(0)
    ks = jax.random.split(key, 6)

    # Case 1: lane-packed fast path (C divides 128, B % (128 // C) == 0).
    B1, C1 = 64, 16
    x1 = jax.random.normal(ks[0], (B1, C1), dtype=jnp.float32)
    l1 = jax.nn.one_hot(jax.random.randint(ks[1], (B1,), 0, C1), C1,
                        dtype=jnp.float32)
    o1 = rel_is_al(x1, l1)
    jax.block_until_ready(o1)
    r1 = _reference(x1, l1)
    assert o1.shape == (B1,), o1.shape
    assert jnp.allclose(o1, r1, atol=2e-3, rtol=2e-3), (o1, r1)

    # Case 2: ragged batch -> row-wise fallback, no padding copies.
    B2, C2 = 37, 8
    x2 = jax.random.normal(ks[2], (B2, C2), dtype=jnp.float32)
    l2 = jax.nn.one_hot(jax.random.randint(ks[3], (B2,), 0, C2), C2,
                        dtype=jnp.float32)
    o2 = rel_is_al(x2, l2)
    jax.block_until_ready(o2)
    r2 = _reference(x2, l2)
    assert o2.shape == (B2,), o2.shape
    assert jnp.allclose(o2, r2, atol=2e-3, rtol=2e-3), (o2, r2)

    # Case 3: class count that does not divide 128 -> row-wise fallback.
    B3, C3 = 16, 20
    x3 = jax.random.normal(ks[4], (B3, C3), dtype=jnp.float32)
    l3 = jax.nn.one_hot(jax.random.randint(ks[5], (B3,), 0, C3), C3,
                        dtype=jnp.float32)
    o3 = rel_is_al(x3, l3)
    jax.block_until_ready(o3)
    r3 = _reference(x3, l3)
    assert o3.shape == (B3,), o3.shape
    assert jnp.allclose(o3, r3, atol=2e-3, rtol=2e-3), (o3, r3)

    print("KERNEL_OK")
</pallas_src>

<mosaic_0001>
module attributes {stable_mosaic.version = 11 : i64} {
  func.func @_packed_kernel(%arg0: i32, %arg1: memref<8x128xf32, #tpu.memory_space<vmem>>, %arg2: memref<8x128xf32, #tpu.memory_space<vmem>>, %arg3: memref<128x128xf32, #tpu.memory_space<vmem>>, %arg4: memref<8x8xf32, #tpu.memory_space<vmem>>) attributes {dimension_semantics = [#tpu.dimension_semantics<parallel>], iteration_bounds = array<i64: 1>, scalar_prefetch = 0 : i64, scratch_operands = 0 : i64, tpu.core_type = #tpu.core_type<tc>, window_params = [{transform_indices = @transform_0, window_bounds = array<i64: 8, 128>}, {transform_indices = @transform_1, window_bounds = array<i64: 8, 128>}, {pipeline_mode = #tpu.pipeline_mode<synchronous>, transform_indices = @transform_2, window_bounds = array<i64: 128, 128>}, {transform_indices = @transform_3, window_bounds = array<i64: 8, 8>}]} {
    %c0 = arith.constant 0 : index
    %c0_0 = arith.constant 0 : index
    %0 = vector.load %arg1[%c0, %c0_0] : memref<8x128xf32, #tpu.memory_space<vmem>>, vector<8x128xf32>
    %c0_1 = arith.constant 0 : index
    %c0_2 = arith.constant 0 : index
    %1 = vector.load %arg2[%c0_1, %c0_2] : memref<8x128xf32, #tpu.memory_space<vmem>>, vector<8x128xf32>
    %2 = tpu.iota {dimensions = array<i32: 1>} : vector<1x128xi32>
    %c127_i32 = arith.constant 127 : i32
    %3 = tpu.dynamic_rotate %0 by %c127_i32 dim 1 : vector<8x128xf32>, i32 -> vector<8x128xf32>
    %c1_i32 = arith.constant 1 : i32
    %4 = tpu.dynamic_rotate %0 by %c1_i32 dim 1 : vector<8x128xf32>, i32 -> vector<8x128xf32>
    %c1_i32_3 = arith.constant 1 : i32
    %5 = vector.broadcast %c1_i32_3 : i32 to vector<1x128xi32>
    %6 = arith.andi %2, %5 : vector<1x128xi32>
    %c0_i32 = arith.constant 0 : i32
    %7 = vector.broadcast %c0_i32 : i32 to vector<1x128xi32>
    %8 = arith.cmpi eq, %6, %7 : vector<1x128xi32>
    %9 = vector.shape_cast %8 : vector<1x128xi1> to vector<1x128xi1>
    %10 = vector.broadcast %9 : vector<1x128xi1> to vector<8x128xi1>
    %11 = arith.select %10, %3, %4 : vector<8x128xi1>, vector<8x128xf32>
    %12 = arith.maximumf %0, %11 : vector<8x128xf32>
    %c126_i32 = arith.constant 126 : i32
    %13 = tpu.dynamic_rotate %12 by %c126_i32 dim 1 : vector<8x128xf32>, i32 -> vector<8x128xf32>
    %c2_i32 = arith.constant 2 : i32
    %14 = tpu.dynamic_rotate %12 by %c2_i32 dim 1 : vector<8x128xf32>, i32 -> vector<8x128xf32>
    %c2_i32_4 = arith.constant 2 : i32
    %15 = vector.broadcast %c2_i32_4 : i32 to vector<1x128xi32>
    %16 = arith.andi %2, %15 : vector<1x128xi32>
    %c0_i32_5 = arith.constant 0 : i32
    %17 = vector.broadcast %c0_i32_5 : i32 to vector<1x128xi32>
    %18 = arith.cmpi eq, %16, %17 : vector<1x128xi32>
    %19 = vector.shape_cast %18 : vector<1x128xi1> to vector<1x128xi1>
    %20 = vector.broadcast %19 : vector<1x128xi1> to vector<8x128xi1>
    %21 = arith.select %20, %13, %14 : vector<8x128xi1>, vector<8x128xf32>
    %22 = arith.maximumf %12, %21 : vector<8x128xf32>
    %c124_i32 = arith.constant 124 : i32
    %23 = tpu.dynamic_rotate %22 by %c124_i32 dim 1 : vector<8x128xf32>, i32 -> vector<8x128xf32>
    %c4_i32 = arith.constant 4 : i32
    %24 = tpu.dynamic_rotate %22 by %c4_i32 dim 1 : vector<8x128xf32>, i32 -> vector<8x128xf32>
    %c4_i32_6 = arith.constant 4 : i32
    %25 = vector.broadcast %c4_i32_6 : i32 to vector<1x128xi32>
    %26 = arith.andi %2, %25 : vector<1x128xi32>
    %c0_i32_7 = arith.constant 0 : i32
    %27 = vector.broadcast %c0_i32_7 : i32 to vector<1x128xi32>
    %28 = arith.cmpi eq, %26, %27 : vector<1x128xi32>
    %29 = vector.shape_cast %28 : vector<1x128xi1> to vector<1x128xi1>
    %30 = vector.broadcast %29 : vector<1x128xi1> to vector<8x128xi1>
    %31 = arith.select %30, %23, %24 : vector<8x128xi1>, vector<8x128xf32>
    %32 = arith.maximumf %22, %31 : vector<8x128xf32>
    %c120_i32 = arith.constant 120 : i32
    %33 = tpu.dynamic_rotate %32 by %c120_i32 dim 1 : vector<8x128xf32>, i32 -> vector<8x128xf32>
    %c8_i32 = arith.constant 8 : i32
    %34 = tpu.dynamic_rotate %32 by %c8_i32 dim 1 : vector<8x128xf32>, i32 -> vector<8x128xf32>
    %c8_i32_8 = arith.constant 8 : i32
    %35 = vector.broadcast %c8_i32_8 : i32 to vector<1x128xi32>
    %36 = arith.andi %2, %35 : vector<1x128xi32>
    %c0_i32_9 = arith.constant 0 : i32
    %37 = vector.broadcast %c0_i32_9 : i32 to vector<1x128xi32>
    %38 = arith.cmpi eq, %36, %37 : vector<1x128xi32>
    %39 = vector.shape_cast %38 : vector<1x128xi1> to vector<1x128xi1>
    %40 = vector.broadcast %39 : vector<1x128xi1> to vector<8x128xi1>
    %41 = arith.select %40, %33, %34 : vector<8x128xi1>, vector<8x128xf32>
    %42 = arith.maximumf %32, %41 : vector<8x128xf32>
    %43 = arith.subf %0, %42 : vector<8x128xf32>
    %44 = math.exp %43 : vector<8x128xf32>
    %45 = arith.mulf %44, %1 : vector<8x128xf32>
    %c127_i32_10 = arith.constant 127 : i32
    %46 = tpu.dynamic_rotate %44 by %c127_i32_10 dim 1 : vector<8x128xf32>, i32 -> vector<8x128xf32>
    %47 = arith.addf %44, %46 : vector<8x128xf32>
    %c127_i32_11 = arith.constant 127 : i32
    %48 = tpu.dynamic_rotate %45 by %c127_i32_11 dim 1 : vector<8x128xf32>, i32 -> vector<8x128xf32>
    %49 = arith.addf %45, %48 : vector<8x128xf32>
    %c126_i32_12 = arith.constant 126 : i32
    %50 = tpu.dynamic_rotate %47 by %c126_i32_12 dim 1 : vector<8x128xf32>, i32 -> vector<8x128xf32>
    %51 = arith.addf %47, %50 : vector<8x128xf32>
    %c126_i32_13 = arith.constant 126 : i32
    %52 = tpu.dynamic_rotate %49 by %c126_i32_13 dim 1 : vector<8x128xf32>, i32 -> vector<8x128xf32>
    %53 = arith.addf %49, %52 : vector<8x128xf32>
    %c124_i32_14 = arith.constant 124 : i32
    %54 = tpu.dynamic_rotate %51 by %c124_i32_14 dim 1 : vector<8x128xf32>, i32 -> vector<8x128xf32>
    %55 = arith.addf %51, %54 : vector<8x128xf32>
    %c124_i32_15 = arith.constant 124 : i32
    %56 = tpu.dynamic_rotate %53 by %c124_i32_15 dim 1 : vector<8x128xf32>, i32 -> vector<8x128xf32>
    %57 = arith.addf %53, %56 : vector<8x128xf32>
    %c120_i32_16 = arith.constant 120 : i32
    %58 = tpu.dynamic_rotate %55 by %c120_i32_16 dim 1 : vector<8x128xf32>, i32 -> vector<8x128xf32>
    %59 = arith.addf %55, %58 : vector<8x128xf32>
    %c120_i32_17 = arith.constant 120 : i32
    %60 = tpu.dynamic_rotate %57 by %c120_i32_17 dim 1 : vector<8x128xf32>, i32 -> vector<8x128xf32>
    %61 = arith.addf %57, %60 : vector<8x128xf32>
    %c15_i32 = arith.constant 15 : i32
    %62 = vector.broadcast %c15_i32 : i32 to vector<1x128xi32>
    %63 = arith.andi %2, %62 : vector<1x128xi32>
    %c0_i32_18 = arith.constant 0 : i32
    %64 = vector.broadcast %c0_i32_18 : i32 to vector<1x128xi32>
    %65 = arith.cmpi eq, %63, %64 : vector<1x128xi32>
    %66 = arith.divf %61, %59 : vector<8x128xf32>
    %cst = arith.constant 0.000000e+00 : f32
    %67 = vector.shape_cast %65 : vector<1x128xi1> to vector<1x128xi1>
    %68 = vector.broadcast %67 : vector<1x128xi1> to vector<8x128xi1>
    %69 = vector.broadcast %cst : f32 to vector<8x128xf32>
    %70 = arith.select %68, %66, %69 : vector<8x128xi1>, vector<8x128xf32>
    %c0_19 = arith.constant 0 : index
    %c0_20 = arith.constant 0 : index
    %71 = vector.load %arg3[%c0_19, %c0_20] : memref<128x128xf32, #tpu.memory_space<vmem>>, vector<128x128xf32>
    %72 = arith.truncf %70 : vector<8x128xf32> to vector<8x128xbf16>
    %73 = arith.extf %72 : vector<8x128xbf16> to vector<8x128xf32>
    %74 = arith.subf %70, %73 : vector<8x128xf32>
    %cst_21 = arith.constant dense<0.000000e+00> : vector<8x128xf32>
    %75 = tpu.matmul %73, %71, %cst_21 {dimension_numbers = #tpu.dot_dimension_numbers<[1], [0], [0], [1], [0, 0, 1, 1], [], []>} : vector<8x128xf32>, vector<128x128xf32>, vector<8x128xf32> -> vector<8x128xf32>
    %cst_22 = arith.constant dense<0.000000e+00> : vector<8x128xf32>
    %76 = tpu.matmul %74, %71, %cst_22 {dimension_numbers = #tpu.dot_dimension_numbers<[1], [0], [0], [1], [0, 0, 1, 1], [], []>} : vector<8x128xf32>, vector<128x128xf32>, vector<8x128xf32> -> vector<8x128xf32>
    %77 = arith.addf %75, %76 : vector<8x128xf32>
    %78 = vector.extract_strided_slice %77 {offsets = [0, 0], sizes = [8, 8], strides = [1, 1]} : vector<8x128xf32> to vector<8x8xf32>
    %c0_23 = arith.constant 0 : index
    %c0_24 = arith.constant 0 : index
    %79 = vector.load %arg4[%c0_23, %c0_24] : memref<8x8xf32, #tpu.memory_space<vmem>>, vector<8x8xf32>
    tpu.vector_store %arg4[%c0_23, %c0_24], %78 {strides = array<i32>} : memref<8x8xf32, #tpu.memory_space<vmem>>, vector<8x8xf32>,
    return
  }
  func.func @transform_0(%arg0: i32) -> (i32, i32) {
    %c0_i32 = arith.constant 0 : i32
    %c0_i32_0 = arith.constant 0 : i32
    return %arg0, %c0_i32 : i32, i32
  }
  func.func @transform_1(%arg0: i32) -> (i32, i32) {
    %c0_i32 = arith.constant 0 : i32
    %c0_i32_0 = arith.constant 0 : i32
    return %arg0, %c0_i32 : i32, i32
  }
  func.func @transform_2(%arg0: i32) -> (i32, i32) {
    %c0_i32 = arith.constant 0 : i32
    %c0_i32_0 = arith.constant 0 : i32
    %c0_i32_1 = arith.constant 0 : i32
    return %c0_i32, %c0_i32_0 : i32, i32
  }
  func.func @transform_3(%arg0: i32) -> (i32, i32) {
    %c0_i32 = arith.constant 0 : i32
    %c0_i32_0 = arith.constant 0 : i32
    return %arg0, %c0_i32 : i32, i32
  }
}

</mosaic_0001>

<bundles_post_ra>
// kernel: rel_is_al.1
= control target key start
LH: loop header
LB: loop body
LE: loop exit
PB: predicated region body
PF: predicated region fallthrough
CT: control target
= control target key end

     0   :  { %s376_s14 = smov 127   ;;  %s377_s15 = smov 1   ;;  %v16_v1 = vlaneseq  ;;  %v384_v32 = vmov 0.0   ;;  %vm385_vm4 = vmmov 0   ;;  %vm252_vm6 = vcmask 64512   ;;  %s516_s0 = inlined_call_operand.vmem [shape: f32[8,128], index: 0, kind: input, shape index: {}]   ;;  %s517_s1 = inlined_call_operand.vmem [shape: f32[8,128], index: 1, kind: input, shape index: {}]   ;;  %s518_s2 = inlined_call_operand.vmem [shape: f32[128,128], index: 2, kind: input, shape index: {}]   ;;  %s519_s3 = inlined_call_operand.vmem [shape: f32[8,8], index: 3, kind: output, shape index: {}]  }
   0x1   :  { %v14_v0 = vld [vmem:[%s516_s0] sm:$0xff]  ;;  %s378_s16 = smov 126   ;;  %s379_s17 = smov 2   ;;  %327 = vmatprep.subr.mxu1 %v384_v32  ;;  %v108_v33 = vld [vmem:[%s518_s2 + $0x78] sm:$0xff]  ;;  %292 = vmatprep.subr.mxu0 %v384_v32  ;;  %v107_v34 = vld [vmem:[%s518_s2 + $0x70] sm:$0xff] }
   0x2   :  { %18 = vrot.lane.b32.xlu0 %v14_v0, %s376_s14  ;;  %v410_v2 = vand.u32 127, %v16_v1  ;;  %s380_s0 = smov 4   ;;  %s381_s18 = smov 124   ;;  %v15_v25 = vld [vmem:[%s517_s1] sm:$0xff]  ;;  %328 = vmatpush3.msra.mxu1 %v108_v33  ;;  %v106_v35 = vld [vmem:[%s518_s2 + $0x68] sm:$0xff]  ;;  %v104_v41 = vld [vmem:[%s518_s2 + $0x58] sm:$0xff] }
   0x3   :  { %s382_s19 = smov 8   ;;  %s383_s20 = smov 120   ;;  %293 = vmatpush3.msra.mxu0 %v108_v33  ;;  %329 = vmatprep.subr.mxu1 %v384_v32  ;;  %v105_v36 = vld [vmem:[%s518_s2 + $0x60] sm:$0xff]  ;;  %v103_v42 = vld [vmem:[%s518_s2 + $0x50] sm:$0xff]  ;;  %v102_v43 = vld [vmem:[%s518_s2 + $0x48] sm:$0xff] }
   0x4   :  { %v22_v3 = vand.u32 1, %v410_v2  ;;  %v32_v8 = vand.u32 2, %v410_v2  ;;  %v42_v13 = vand.u32 4, %v410_v2  ;;  %v52_v18 = vand.u32 8, %v410_v2  ;;  %294 = vmatprep.subr.mxu0 %v384_v32  ;;  %330 = vmatpush3.msra.mxu1 %v107_v34  ;;  %v101_v44 = vld [vmem:[%s518_s2 + $0x40] sm:$0xff]  ;;  %v100_v45 = vld [vmem:[%s518_s2 + $0x38] sm:$0xff] }
   0x5   :  { %295 = vmatpush3.msra.mxu0 %v107_v34  ;;  %331 = vmatprep.subr.mxu1 %v384_v32  ;;  %v99_v46 = vld [vmem:[%s518_s2 + $0x30] sm:$0xff]  ;;  %v98_v49 = vld [vmem:[%s518_s2 + $0x28] sm:$0xff]  ;;  %v97_v52 = vld [vmem:[%s518_s2 + $0x20] sm:$0xff]  ;;  %v86_v59 = vand.u32 15, %v410_v2 }
   0x6   :  { %20 = vrot.lane.b32.xlu0 %v14_v0, %s377_s15  ;;  %vm23_vm0 = vcmp.eq.s32.totalorder %v22_v3, 0  ;;  %vm33_vm1 = vcmp.eq.s32.totalorder %v32_v8, 0  ;;  %vm43_vm2 = vcmp.eq.s32.totalorder %v42_v13, 0  ;;  %vm53_vm3 = vcmp.eq.s32.totalorder %v52_v18, 0  ;;  %296 = vmatprep.subr.mxu0 %v384_v32  ;;  %v96_v53 = vld [vmem:[%s518_s2 + $0x18] sm:$0xff]  ;;  %v95_v54 = vld [vmem:[%s518_s2 + $0x10] sm:$0xff] }
   0x7   :  { %332 = vmatpush3.msra.mxu1 %v106_v35  ;;  %297 = vmatpush3.msra.mxu0 %v106_v35  ;;  %v94_v55 = vld [vmem:[%s518_s2 + $0x8] sm:$0xff]  ;;  %v93_v56 = vld [vmem:[%s518_s2] sm:$0xff]  ;;  %vm87_vm5 = vcmp.eq.s32.totalorder %v86_v59, 0 }
   0x8   :  { %333 = vmatprep.subr.mxu1 %v384_v32  ;;  %298 = vmatprep.subr.mxu0 %v384_v32 }
   0x9   :  { %334 = vmatpush3.msra.mxu1 %v105_v36  ;;  %299 = vmatpush3.msra.mxu0 %v105_v36 }
   0xa   :  { %335 = vmatprep.subr.mxu1 %v384_v32  ;;  %300 = vmatprep.subr.mxu0 %v384_v32 }
   0xb   :  { %336 = vmatpush3.msra.mxu1 %v104_v41  ;;  %301 = vmatpush3.msra.mxu0 %v104_v41 }
   0xc   :  { %337 = vmatprep.subr.mxu1 %v384_v32  ;;  %302 = vmatprep.subr.mxu0 %v384_v32 }
   0xd   :  { %338 = vmatpush3.msra.mxu1 %v103_v42  ;;  %303 = vmatpush3.msra.mxu0 %v103_v42 }
   0xe   :  { %339 = vmatprep.subr.mxu1 %v384_v32  ;;  %304 = vmatprep.subr.mxu0 %v384_v32 }
   0xf   :  { %340 = vmatpush3.msra.mxu1 %v102_v43  ;;  %305 = vmatpush3.msra.mxu0 %v102_v43 }
  0x10   :  { %341 = vmatprep.subr.mxu1 %v384_v32  ;;  %306 = vmatprep.subr.mxu0 %v384_v32 }
  0x11   :  { %342 = vmatpush3.msra.mxu1 %v101_v44  ;;  %307 = vmatpush3.msra.mxu0 %v101_v44 }
  0x12   :  { %343 = vmatprep.subr.mxu1 %v384_v32  ;;  %308 = vmatprep.subr.mxu0 %v384_v32 }
  0x13   :  { %344 = vmatpush3.msra.mxu1 %v100_v45  ;;  %309 = vmatpush3.msra.mxu0 %v100_v45 }
  0x14   :  { %345 = vmatprep.subr.mxu1 %v384_v32  ;;  %310 = vmatprep.subr.mxu0 %v384_v32 }
  0x15   :  { %346 = vmatpush3.msra.mxu1 %v99_v46  ;;  %311 = vmatpush3.msra.mxu0 %v99_v46 }
  0x16   :  { %347 = vmatprep.subr.mxu1 %v384_v32  ;;  %312 = vmatprep.subr.mxu0 %v384_v32 }
  0x17   :  { %348 = vmatpush3.msra.mxu1 %v98_v49  ;;  %313 = vmatpush3.msra.mxu0 %v98_v49 }
  0x18   :  { %349 = vmatprep.subr.mxu1 %v384_v32  ;;  %314 = vmatprep.subr.mxu0 %v384_v32 }
  0x19   :  { %350 = vmatpush3.msra.mxu1 %v97_v52  ;;  %315 = vmatpush3.msra.mxu0 %v97_v52 }
  0x1a   :  { %351 = vmatprep.subr.mxu1 %v384_v32  ;;  %316 = vmatprep.subr.mxu0 %v384_v32 }
  0x1b   :  { %352 = vmatpush3.msra.mxu1 %v96_v53  ;;  %317 = vmatpush3.msra.mxu0 %v96_v53 }
  0x1c   :  { %353 = vmatprep.subr.mxu1 %v384_v32  ;;  %318 = vmatprep.subr.mxu0 %v384_v32 }
  0x1d   :  { %354 = vmatpush3.msra.mxu1 %v95_v54  ;;  %319 = vmatpush3.msra.mxu0 %v95_v54 }
  0x1e   :  { %355 = vmatprep.subr.mxu1 %v384_v32  ;;  %320 = vmatprep.subr.mxu0 %v384_v32 }
  0x1f   :  { %356 = vmatpush3.msra.mxu1 %v94_v55  ;;  %321 = vmatpush3.msra.mxu0 %v94_v55 }
  0x20   :  { %357 = vmatprep.subr.mxu1 %v384_v32  ;;  %359 = vmatprep.mubr.msk.f32.mxu1 %vm385_vm4, %v384_v32 }
  0x21   :  { %358 = vmatpush3.msra.mxu1 %v93_v56  ;;  %322 = vmatprep.subr.mxu0 %v384_v32 }
  0x22   :  { %323 = vmatpush3.msra.mxu0 %v93_v56  ;;  %324 = vmatprep.mubr.msk.f32.mxu0 %vm385_vm4, %v384_v32 }
  0x74   :  { %v19_v4 = vpop.permute.xlu0 %18 }
  0x78   :  { %v21_v5 = vpop.permute.xlu0 %20 }
  0x79   :  { %v26_v6 = vsel %vm23_vm0, %v19_v4, %v21_v5 }
  0x7a   :  { %v27_v7 = vmax.f32 %v14_v0, %v26_v6 }
  0x7c   :  { %28 = vrot.lane.b32.xlu1 %v27_v7, %s378_s16 }
  0x80   :  { %30 = vrot.lane.b32.xlu1 %v27_v7, %s379_s17 }
  0xee   :  { %v29_v9 = vpop.permute.xlu1 %28 }
  0xf2   :  { %v31_v10 = vpop.permute.xlu1 %30 }
  0xf3   :  { %v36_v11 = vsel %vm33_vm1, %v29_v9, %v31_v10 }
  0xf4   :  { %v37_v12 = vmax.f32 %v27_v7, %v36_v11 }
  0xf6   :  { %40 = vrot.lane.b32.xlu1 %v37_v12, %s380_s0  ;;  %38 = vrot.lane.b32.xlu0 %v37_v12, %s381_s18 }
 0x168   :  { %v41_v14 = vpop.permute.xlu1 %40  ;;  %v39_v15 = vpop.permute.xlu0 %38 }
 0x169   :  { %v46_v16 = vsel %vm43_vm2, %v39_v15, %v41_v14 }
 0x16a   :  { %v47_v17 = vmax.f32 %v37_v12, %v46_v16 }
 0x16c   :  { %50 = vrot.lane.b32.xlu1 %v47_v17, %s382_s19  ;;  %48 = vrot.lane.b32.xlu0 %v47_v17, %s383_s20 }
 0x1de   :  { %v51_v19 = vpop.permute.xlu1 %50  ;;  %v49_v20 = vpop.permute.xlu0 %48 }
 0x1df   :  { %v56_v21 = vsel %vm53_vm3, %v49_v20, %v51_v19 }
 0x1e0   :  { %v57_v22 = vmax.f32 %v47_v17, %v56_v21 }
 0x1e2   :  { %v58_v23 = vsub.f32 %v14_v0, %v57_v22 }
 0x1e4   :  { %v59_v24 = vmul.f32 1.442695, %v58_v23 }
 0x1e6   :  { %372 = vpow2.f32 %v59_v24 }
 0x1f3   :  { %v373_v26 = vpop.eup %372 }
 0x1f4   :  { %62 = vrot.lane.b32.xlu0 %v373_v26, %s376_s14  ;;  %v61_v27 = vmul.f32 %v373_v26, %v15_v25 }
 0x1f6   :  { %65 = vrot.lane.b32.xlu1 %v61_v27, %s376_s14 }
 0x266   :  { %v63_v28 = vpop.permute.xlu0 %62 }
 0x267   :  { %v64_v29 = vadd.f32 %v373_v26, %v63_v28 }
 0x268   :  { %v66_v30 = vpop.permute.xlu1 %65 }
 0x269   :  { %v67_v31 = vadd.f32 %v66_v30, %v61_v27  ;;  %68 = vrot.lane.b32.xlu0 %v64_v29, %s378_s16 }
 0x26b   :  { %71 = vrot.lane.b32.xlu1 %v67_v31, %s378_s16 }
 0x2db   :  { %v69_v37 = vpop.permute.xlu0 %68 }
 0x2dc   :  { %v70_v38 = vadd.f32 %v69_v37, %v64_v29 }
 0x2dd   :  { %v72_v39 = vpop.permute.xlu1 %71 }
 0x2de   :  { %v73_v40 = vadd.f32 %v72_v39, %v67_v31  ;;  %74 = vrot.lane.b32.xlu0 %v70_v38, %s381_s18 }
 0x2e0   :  { %77 = vrot.lane.b32.xlu1 %v73_v40, %s381_s18 }
 0x350   :  { %v75_v47 = vpop.permute.xlu0 %74 }
 0x351   :  { %v76_v48 = vadd.f32 %v75_v47, %v70_v38 }
 0x352   :  { %v78_v50 = vpop.permute.xlu1 %77 }
 0x353   :  { %v79_v51 = vadd.f32 %v78_v50, %v73_v40  ;;  %80 = vrot.lane.b32.xlu0 %v76_v48, %s383_s20 }
 0x355   :  { %83 = vrot.lane.b32.xlu1 %v79_v51, %s383_s20 }
 0x3c5   :  { %v81_v57 = vpop.permute.xlu0 %80 }
 0x3c6   :  { %v82_v58 = vadd.f32 %v81_v57, %v76_v48 }
 0x3c7   :  { %v84_v60 = vpop.permute.xlu1 %83 }
 0x3c8   :  { %374 = vrcp.f32 %v82_v58  ;;  %v85_v61 = vadd.f32 %v84_v60, %v79_v51 }
 0x3d5   :  { %v375_v62 = vpop.eup %374 }
 0x3d6   :  { %v89_v63 = vmul.f32 %v375_v62, %v85_v61 }
 0x3d8   :  { %v92_v0 = vsel %vm87_vm5, %v89_v63, 0.0 }
 0x3d9   :  { %v109_v1 = vpack.c.bf16 %v92_v0, %v92_v0 }
 0x3db   :  { %v110_v3 = vunpack.c.l.bf16 %v109_v1 }
 0x3dd   :  { %360 = vmatmul.mubr.f32.vlgmr.msra.gmra.mxu1 %v110_v3  ;;  %v111_v4 = vsub.f32 %v92_v0, %v110_v3 }
 0x3df   :  { %325 = vmatmul.mubr.f32.vlgmr.msra.gmra.mxu0 %v111_v4 }
 0x49d   :  { %v248_v5 = vpop.f32.mrf.mxu1 }
 0x49f   :  { %v178_v6 = vpop.f32.mrf.mxu0  ;;  %v361_v7 = vpop.f32.mrf.mxu1 }
 0x4a0   :  { %v249_v8 = vadd.f32 %v248_v5, %v178_v6 }
 0x4a1   :  { %v326_v9 = vpop.f32.mrf.mxu0 }
 0x4a2   :  { %253 = vst.msk [vmem:[%s519_s3] sm:$0xff] %vm252_vm6, %v249_v8 }

</bundles_post_ra>
